<compile_context>
chip_gen: v7x
topology: tpu7x:2x2x1
jax: 0.10.0
libtpu: 0.0.40
codegen_flags: <defaults>
</compile_context>

<pallas_src>
import functools

import jax
import jax.numpy as jnp
from jax import lax
from jax.experimental import pallas as pl
from jax.experimental.pallas import tpu as pltpu

LANES = 128
SUBLANES = 8


def _product_loss_kernel(p_ref, t_ref, out_ref, *, sub_rows, rem_rows):
    """One (tile_rows, 128) interleaved block -> (8, 128) lane-parallel partial sums."""
    tile_rows = p_ref.shape[0]
    n_sub = tile_rows // sub_rows

    # Constant lane mask: keep lanes == 3 (mod 4) — one finished product per record.
    lane = lax.broadcasted_iota(jnp.int32, (1, LANES), 1)
    mask3 = jnp.broadcast_to((lane & 3) == 3, (sub_rows, LANES))  # hoisted out of the loop

    def tile_sum(keep_fn):
        def body(s, acc):
            off = pl.multiple_of(s * sub_rows, sub_rows)
            p = p_ref[pl.ds(off, sub_rows), :].astype(jnp.float32)
            t = t_ref[pl.ds(off, sub_rows), :].astype(jnp.float32)
            # Per-record feature alignment via cheap XLU lane rotations:
            #   p1[:, k] = p[:, k-1]  ->  lanes ==1: px, ==2: py, ==3: l0
            p1 = pltpu.roll(p, shift=1, axis=1)
            d = p1 - t                                    # dx @ lanes==1, dy @ lanes==2
            d2 = d * d
            sq = d2 + pltpu.roll(d2, shift=1, axis=1)     # dx^2 + dy^2 @ lanes==2
            # 2-class CE, branch-free softplus form (label is t @ lanes==3, diff = l0-l1):
            #   CE = softplus((2*label - 1) * diff)
            diff = p1 - p
            ad = jnp.abs(diff)
            ce = 0.5 * ad + (t - 0.5) * diff + jnp.log(1.0 + jnp.exp(-ad))
            prod = pltpu.roll(sq, shift=1, axis=1) * ce   # (dx^2+dy^2)*CE @ lanes==3
            contrib = jnp.where(keep_fn(s), prod, 0.0)    # select: NaN/Inf-safe masking
            return acc + jnp.sum(contrib.reshape(-1, SUBLANES, LANES), axis=0)

        # Non-unrolled loop bounds live ranges to one sub-chunk's worth of temporaries.
        return lax.fori_loop(0, n_sub, body, jnp.zeros((SUBLANES, LANES), jnp.float32))

    if rem_rows == 0:
        # All tiles are full: hot path, no row-bound checks at all.
        out_ref[...] = tile_sum(lambda s: mask3)
    else:
        i = pl.program_id(0)
        last = pl.num_programs(0) - 1

        @pl.when(i != last)
        def _full():
            out_ref[...] = tile_sum(lambda s: mask3)

        @pl.when(i == last)
        def _partial():
            # Cold path: only the boundary tile masks rows past the real input
            # (the remainder of its VMEM block holds unspecified/stale data).
            row = lax.broadcasted_iota(jnp.int32, (sub_rows, LANES), 0)
            out_ref[...] = tile_sum(
                lambda s: jnp.logical_and(mask3, s * sub_rows + row < rem_rows))


def _run_bulk(p2, t2, tile_rows, sub_rows):
    """Sum of (dx^2+dy^2)*CE over all records in the (rows, 128) interleaved view."""
    rows = p2.shape[0]
    tile_rows = max(SUBLANES, (min(int(tile_rows), rows) // SUBLANES) * SUBLANES)
    sub_rows = max(SUBLANES, (min(int(sub_rows), tile_rows) // SUBLANES) * SUBLANES)
    tile_rows = (tile_rows // sub_rows) * sub_rows          # whole sub-chunks per tile
    ntiles = -(-rows // tile_rows)
    rem_rows = rows - (ntiles - 1) * tile_rows
    if rem_rows == tile_rows:
        rem_rows = 0

    kernel = functools.partial(_product_loss_kernel,
                               sub_rows=sub_rows, rem_rows=rem_rows)
    partial_sums = pl.pallas_call(
        kernel,
        out_shape=jax.ShapeDtypeStruct((ntiles * SUBLANES, LANES), jnp.float32),
        grid=(ntiles,),
        in_specs=[pl.BlockSpec((tile_rows, LANES), lambda i: (i, 0)),
                  pl.BlockSpec((tile_rows, LANES), lambda i: (i, 0))],
        out_specs=pl.BlockSpec((SUBLANES, LANES), lambda i: (i, 0)),
        compiler_params=pltpu.CompilerParams(
            # "parallel": tiles shard across TensorCores on multi-TC parts (v7x),
            # plain sequential loop on single-TC v5e/v6e.
            dimension_semantics=("parallel",),
            vmem_limit_bytes=32 * 1024 * 1024),
    )(p2, t2)
    return jnp.sum(partial_sums)


def _tail_sum(p, t):
    """Plain-JAX sum of (dx^2+dy^2)*CE over a small (n, 4) ragged record tail."""
    if p.shape[0] == 0:
        return jnp.zeros((), jnp.float32)
    p = p.astype(jnp.float32)
    t = t.astype(jnp.float32)
    dxy = p[:, :2] - t[:, 1:3]
    sq = jnp.sum(dxy * dxy, axis=1)
    diff = p[:, 2] - p[:, 3]
    z = jnp.where(t[:, 3] > 0.5, diff, -diff)
    ce = jnp.maximum(z, 0.0) + jnp.log(1.0 + jnp.exp(-jnp.abs(z)))
    return jnp.sum(sq * ce)


def _maybe_f32(x):
    # bf16/f16 are streamed at native width and upcast in-register inside the kernel
    # (halves HBM traffic on mem-bound v5e/v6e); anything else is converted up front.
    if x.dtype == jnp.float32 or x.dtype == jnp.bfloat16 or x.dtype == jnp.float16:
        return x
    return x.astype(jnp.float32)


def product_loss(pred, target, *, tile_rows=4096, sub_rows=512):
    """pred, target: (B, S, 4). Returns the scalar ProductLoss (matches the PyTorch module)."""
    B, S, F = pred.shape
    assert F == 4 and target.shape == (B, S, 4)
    n_rec = B * S
    pred = _maybe_f32(pred)
    target = _maybe_f32(target)

    if n_rec % 32 == 0 and n_rec >= 256:
        # Zero-copy: the interleaved flat stream fills whole 128-lane rows.
        rows = n_rec // 32
        total = _run_bulk(pred.reshape(rows, LANES), target.reshape(rows, LANES),
                          tile_rows, sub_rows)
    else:
        # Ragged record count: kernel on the 256-record-aligned bulk, tiny tail in JAX.
        # TODO(synk): arrange B*S % 32 == 0 upstream so the bulk slice is zero-copy too.
        n_bulk = (n_rec // 256) * 256
        pr = pred.reshape(n_rec, 4)
        tr = target.reshape(n_rec, 4)
        total = _tail_sum(pr[n_bulk:], tr[n_bulk:])
        if n_bulk:
            total = total + _run_bulk(pr[:n_bulk].reshape(n_bulk // 32, LANES),
                                      tr[:n_bulk].reshape(n_bulk // 32, LANES),
                                      tile_rows, sub_rows)
    # Kernel/tail accumulate sum_r (dx^2 + dy^2) * CE; apply the xy-mean 1/2 and 1/N.
    return total * (0.5 / n_rec)


def product_loss_ref(pred, target):
    """Pure-JAX reference matching the PyTorch forward exactly."""
    t = target[:, :, 1:]
    loss_xy = jnp.mean((pred[:, :, :2] - t[:, :, :2]) ** 2, axis=2).reshape(-1)
    logits = pred[:, :, 2:].reshape(-1, 2)
    labels = t[:, :, 2].reshape(-1).astype(jnp.int32)
    lse = jax.scipy.special.logsumexp(logits, axis=1)
    chosen = jnp.take_along_axis(logits, labels[:, None], axis=1)[:, 0]
    return jnp.mean(loss_xy * (lse - chosen))


if __name__ == "__main__":
    key = jax.random.PRNGKey(0)

    def make_inputs(k, B, S):
        k1, k2, k3 = jax.random.split(k, 3)
        pred = jax.random.normal(k1, (B, S, 4), dtype=jnp.float32)
        tgt_cont = jax.random.normal(k2, (B, S, 3), dtype=jnp.float32)
        tgt_lbl = jax.random.randint(k3, (B, S, 1), 0, 2).astype(jnp.float32)
        target = jnp.concatenate([tgt_cont, tgt_lbl], axis=-1)  # [ignored, x, y, label]
        return pred, target

    cases = [
        (2, 384, {}),                               # zero-copy path, one full tile
        (2, 384, dict(tile_rows=8, sub_rows=8)),    # multi-tile "parallel" grid
        (2, 704, dict(tile_rows=16, sub_rows=16)),  # partial (masked) boundary tile
        (3, 100, {}),                               # ragged: kernel bulk + plain-JAX tail
        (2, 8, {}),                                 # tiny: all-tail fallback
    ]
    keys = jax.random.split(key, len(cases))
    for k, (B, S, kw) in zip(keys, cases):
        pred, target = make_inputs(k, B, S)
        got = jax.block_until_ready(product_loss(pred, target, **kw))
        ref = jax.block_until_ready(product_loss_ref(pred, target))
        assert jnp.allclose(got, ref, rtol=1e-5, atol=1e-5), (B, S, kw, got, ref)

    print("KERNEL_OK")
</pallas_src>

<mosaic_0001>
module attributes {stable_mosaic.version = 11 : i64} {
  func.func @_product_loss_kernel(%arg0: i32, %arg1: memref<24x128xf32, #tpu.memory_space<vmem>>, %arg2: memref<24x128xf32, #tpu.memory_space<vmem>>, %arg3: memref<8x128xf32, #tpu.memory_space<vmem>>) attributes {dimension_semantics = [#tpu.dimension_semantics<parallel>], iteration_bounds = array<i64: 1>, scalar_prefetch = 0 : i64, scratch_operands = 0 : i64, tpu.core_type = #tpu.core_type<tc>, window_params = [{transform_indices = @transform_0, window_bounds = array<i64: 24, 128>}, {transform_indices = @transform_1, window_bounds = array<i64: 24, 128>}, {transform_indices = @transform_2, window_bounds = array<i64: 8, 128>}]} {
    %0 = tpu.iota {dimensions = array<i32: 1>} : vector<1x128xi32>
    %c3_i32 = arith.constant 3 : i32
    %1 = vector.broadcast %c3_i32 : i32 to vector<1x128xi32>
    %2 = arith.andi %0, %1 : vector<1x128xi32>
    %c3_i32_0 = arith.constant 3 : i32
    %3 = vector.broadcast %c3_i32_0 : i32 to vector<1x128xi32>
    %4 = arith.cmpi eq, %2, %3 : vector<1x128xi32>
    %5 = vector.shape_cast %4 : vector<1x128xi1> to vector<1x128xi1>
    %6 = vector.broadcast %5 : vector<1x128xi1> to vector<24x128xi1>
    %cst = arith.constant 0.000000e+00 : f32
    %7 = vector.broadcast %cst : f32 to vector<8x128xf32>
    %c0_i32 = arith.constant 0 : i32
    %c24_i32 = arith.constant 24 : i32
    %8 = arith.muli %c0_i32, %c24_i32 : i32
    %9 = tpu.assume_multiple %8, 24 : i32
    %10 = arith.index_cast %9 : i32 to index
    %c0 = arith.constant 0 : index
    %11 = vector.load %arg1[%10, %c0] : memref<24x128xf32, #tpu.memory_space<vmem>>, vector<24x128xf32>
    %12 = arith.index_cast %9 : i32 to index
    %c0_1 = arith.constant 0 : index
    %13 = vector.load %arg2[%12, %c0_1] : memref<24x128xf32, #tpu.memory_space<vmem>>, vector<24x128xf32>
    %c1_i32 = arith.constant 1 : i32
    %14 = tpu.dynamic_rotate %11 by %c1_i32 dim 1 : vector<24x128xf32>, i32 -> vector<24x128xf32>
    %15 = arith.subf %14, %13 : vector<24x128xf32>
    %16 = arith.mulf %15, %15 : vector<24x128xf32>
    %c1_i32_2 = arith.constant 1 : i32
    %17 = tpu.dynamic_rotate %16 by %c1_i32_2 dim 1 : vector<24x128xf32>, i32 -> vector<24x128xf32>
    %18 = arith.addf %16, %17 : vector<24x128xf32>
    %19 = arith.subf %14, %11 : vector<24x128xf32>
    %20 = math.absf %19 : vector<24x128xf32>
    %cst_3 = arith.constant 5.000000e-01 : f32
    %21 = vector.broadcast %cst_3 : f32 to vector<24x128xf32>
    %22 = arith.mulf %21, %20 : vector<24x128xf32>
    %cst_4 = arith.constant 5.000000e-01 : f32
    %23 = vector.broadcast %cst_4 : f32 to vector<24x128xf32>
    %24 = arith.subf %13, %23 : vector<24x128xf32>
    %25 = arith.mulf %24, %19 : vector<24x128xf32>
    %26 = arith.addf %22, %25 : vector<24x128xf32>
    %cst_5 = arith.constant 0.000000e+00 : f32
    %27 = vector.broadcast %cst_5 : f32 to vector<24x128xf32>
    %28 = arith.subf %27, %20 : vector<24x128xf32>
    %29 = math.exp %28 : vector<24x128xf32>
    %cst_6 = arith.constant 1.000000e+00 : f32
    %30 = vector.broadcast %cst_6 : f32 to vector<24x128xf32>
    %31 = arith.addf %30, %29 : vector<24x128xf32>
    %32 = math.log %31 : vector<24x128xf32>
    %33 = arith.addf %26, %32 : vector<24x128xf32>
    %c1_i32_7 = arith.constant 1 : i32
    %34 = tpu.dynamic_rotate %18 by %c1_i32_7 dim 1 : vector<24x128xf32>, i32 -> vector<24x128xf32>
    %35 = arith.mulf %34, %33 : vector<24x128xf32>
    %cst_8 = arith.constant 0.000000e+00 : f32
    %36 = vector.broadcast %cst_8 : f32 to vector<24x128xf32>
    %37 = arith.select %6, %35, %36 : vector<24x128xi1>, vector<24x128xf32>
    %38 = vector.shape_cast %37 : vector<24x128xf32> to vector<3x8x128xf32>
    %cst_9 = arith.constant dense<0.000000e+00> : vector<8x128xf32>
    %39 = vector.multi_reduction <add>, %38, %cst_9 [0] : vector<3x8x128xf32> to vector<8x128xf32>
    %40 = arith.addf %7, %39 : vector<8x128xf32>
    %c1_i32_10 = arith.constant 1 : i32
    %c0_11 = arith.constant 0 : index
    %c0_12 = arith.constant 0 : index
    %41 = vector.load %arg3[%c0_11, %c0_12] : memref<8x128xf32, #tpu.memory_space<vmem>>, vector<8x128xf32>
    tpu.vector_store %arg3[%c0_11, %c0_12], %40 {strides = array<i32>} : memref<8x128xf32, #tpu.memory_space<vmem>>, vector<8x128xf32>,
    return
  }
  func.func @transform_0(%arg0: i32) -> (i32, i32) {
    %c0_i32 = arith.constant 0 : i32
    %c0_i32_0 = arith.constant 0 : i32
    return %arg0, %c0_i32 : i32, i32
  }
  func.func @transform_1(%arg0: i32) -> (i32, i32) {
    %c0_i32 = arith.constant 0 : i32
    %c0_i32_0 = arith.constant 0 : i32
    return %arg0, %c0_i32 : i32, i32
  }
  func.func @transform_2(%arg0: i32) -> (i32, i32) {
    %c0_i32 = arith.constant 0 : i32
    %c0_i32_0 = arith.constant 0 : i32
    return %arg0, %c0_i32 : i32, i32
  }
}

</mosaic_0001>

<bundles_post_ra>
// kernel: tpu_custom_call.1
= control target key start
LH: loop header
LB: loop body
LE: loop exit
PB: predicated region body
PF: predicated region fallthrough
CT: control target
= control target key end

     0   :  { %7 = vsyncpa [#allocation3], 0  ;;  %s294_s0 = inlined_call_operand.hbm [shape: f32[24,128], index: 0, kind: input, shape index: {}]   ;;  %s295_s1 = inlined_call_operand.hbm [shape: f32[24,128], index: 1, kind: input, shape index: {}]   ;;  %s296_s2 = inlined_call_operand.hbm [shape: f32[8,128], index: 2, kind: output, shape index: {}]  }
   0x1   :  { %8 = vsyncpa [#allocation6], 0 }
   0x2   :  { %9 = vsyncpa [#allocation4], 0  ;;  %s237_s9 = smov [#allocation2]   ;;  %s165_s13 = scalar_lea.hbm %s294_s0, 384 }
   0x3   :  { %s15_s10 = sshll.u32 %s237_s9, 4  ;;  %p166_p0 = scmp.ne.s32.totalorder %s294_s0, %s165_s13  ;;  %s16_s10 = int_to_ptr.vmem [resolvable:$true] %s15_s10 }
   0x4   :  { %p169_p1 = scmp.lt.u32.totalorder %s165_s13, %s294_s0 }
   0x6   :  { %p171_p2 = pnand %p169_p1, %p166_p0 }
   0x8   :  { %174 = shalt.err (!%p171_p2)
}
   0x9   :  { %s175_s18 = scalar_lea.vmem %s16_s10, 384  ;;  %p180_p4 = scmp.lt.s32.totalorder %s16_s10, %s16_s10 }
   0xa   :  { %p176_p3 = scmp.ne.s32.totalorder %s16_s10, %s175_s18  ;;  %p181_p5 = scmp.lt.s32.totalorder %s175_s18, %s175_s18 }
   0xc   :  { %p182_p6 = por %p181_p5, %p180_p4 }
   0xe   :  { %p183_p7 = pnand %p182_p6, %p176_p3 }
  0x10   :  { %186 = shalt.err (!%p183_p7)
}
  0x11   :  { %s238_s19 = smov 128   ;;  %s239_s20 = smov 8  }
  0x12   :  { %21 = dma.hbm_to_vmem [thread:$0]  %s294_s0, 384, %s16_s10, [#allocation3], %s238_s19, %s238_s19, %s239_s20  }
  0x13   :  { %s240_s23 = smov [#allocation5]   ;;  %s187_s27 = scalar_lea.hbm %s295_s1, 384 }
  0x14   :  { %s27_s24 = sshll.u32 %s240_s23, 4  ;;  %p188_p8 = scmp.ne.s32.totalorder %s295_s1, %s187_s27  ;;  %s28_s24 = int_to_ptr.vmem [resolvable:$true] %s27_s24 }
  0x15   :  { %p191_p9 = scmp.lt.u32.totalorder %s187_s27, %s295_s1 }
  0x17   :  { %p193_p10 = pnand %p191_p9, %p188_p8 }
  0x19   :  { %196 = shalt.err (!%p193_p10)
}
  0x1a   :  { %s197_s4 = scalar_lea.vmem %s28_s24, 384  ;;  %p202_p12 = scmp.lt.s32.totalorder %s28_s24, %s28_s24 }
  0x1b   :  { %p198_p11 = scmp.ne.s32.totalorder %s28_s24, %s197_s4  ;;  %p203_p13 = scmp.lt.s32.totalorder %s197_s4, %s197_s4 }
  0x1d   :  { %p204_p0 = por %p203_p13, %p202_p12 }
  0x1f   :  { %p205_p1 = pnand %p204_p0, %p198_p11 }
  0x21   :  { %208 = shalt.err (!%p205_p1)
}
  0x22   :  { %33 = dma.hbm_to_vmem [thread:$0]  %s295_s1, 384, %s28_s24, [#allocation6], %s238_s19, %s238_s19, %s239_s20  }
  0x23   :  { %231 = dma.done.wait [#allocation3], 384  }
  0x24   :  { %232 = vsyncadd [#allocation3], 4294966912 }
  0x25   :  { %233 = dma.done.wait [#allocation6], 384  }
  0x26   :  { %234 = vsyncadd [#allocation6], 4294966912  ;;  %v48_v0 = vld [vmem:[#allocation2 + $0x10] sm:$0xff]  ;;  %v46_v1 = vld [vmem:[#allocation2] sm:$0xff]  ;;  %s241_s6 = smov 1   ;;  %v40_v40 = vlaneseq  ;;  %s242_s1 = smov [#allocation7]  }
  0x27   :  { %56 = vrot.lane.b32.xlu1 %v48_v0, %s241_s6  ;;  %52 = vrot.lane.b32.xlu0 %v46_v1, %s241_s6  ;;  %v47_v2 = vld [vmem:[#allocation2 + $0x8] sm:$0xff]  ;;  %v49_v4 = vld [vmem:[#allocation5] sm:$0xff]  ;;  %v50_v9 = vld [vmem:[#allocation5 + $0x8] sm:$0xff]  ;;  %s134_s7 = sshll.u32 %s242_s1, 4  ;;  %s135_s7 = int_to_ptr.vmem [resolvable:$true] %s134_s7 }
  0x28   :  { %v51_v3 = vld [vmem:[#allocation5 + $0x10] sm:$0xff]  ;;  %v144_v41 = vadd.f32 -0.5, %v49_v4  ;;  %v145_v45 = vadd.f32 -0.5, %v50_v9  ;;  %v41_v48 = vand.u32 127, %v40_v40  ;;  %s209_s8 = scalar_lea.vmem %s135_s7, 128  ;;  %p214_p3 = scmp.lt.s32.totalorder %s135_s7, %s135_s7 }
  0x29   :  { %v146_v39 = vadd.f32 -0.5, %v51_v3  ;;  %p210_p2 = scmp.ne.s32.totalorder %s135_s7, %s209_s8  ;;  %p215_p4 = scmp.lt.s32.totalorder %s209_s8, %s209_s8 }
  0x2a   :  { %v42_v57 = vand.u32 3, %v41_v48 }
  0x2b   :  { %54 = vrot.lane.b32.xlu0 %v47_v2, %s241_s6  ;;  %p216_p5 = por %p215_p4, %p214_p3 }
  0x2c   :  { %vm43_vm0 = vcmp.eq.s32.totalorder %v42_v57, 3 }
  0x2d   :  { %p217_p6 = pnand %p216_p5, %p210_p2 }
  0x99   :  { %v57_v5 = vpop.permute.xlu1 %56  ;;  %v53_v6 = vpop.permute.xlu0 %52 }
  0x9a   :  { %v60_v7 = vsub.f32 %v57_v5, %v51_v3  ;;  %v58_v8 = vsub.f32 %v53_v6, %v49_v4  ;;  %v73_v21 = vsub.f32 %v53_v6, %v46_v1  ;;  %v75_v22 = vsub.f32 %v57_v5, %v48_v0 }
  0x9c   :  { %v61_v10 = vmul.f32 %v58_v8, %v58_v8  ;;  %v63_v12 = vmul.f32 %v60_v7, %v60_v7  ;;  %v76_v24 = vand.u32 2147483647, %v73_v21  ;;  %v78_v25 = vand.u32 2147483647, %v75_v22 }
  0x9d   :  { %v55_v11 = vpop.permute.xlu0 %54  ;;  %v87_v47 = vmul.f32 %v146_v39, %v75_v22  ;;  %v85_v50 = vmul.f32 %v144_v41, %v73_v21 }
  0x9e   :  { %v59_v13 = vsub.f32 %v55_v11, %v50_v9  ;;  %64 = vrot.lane.b32.xlu1 %v61_v10, %s241_s6  ;;  %v74_v23 = vsub.f32 %v55_v11, %v47_v2  ;;  %v91_v27 = vsub.f32 0.0, %v76_v24  ;;  %v93_v28 = vsub.f32 0.0, %v78_v25 }
  0x9f   :  { %v79_v44 = vmul.f32 0.5, %v76_v24  ;;  %v81_v49 = vmul.f32 0.5, %v78_v25 }
  0xa0   :  { %v62_v14 = vmul.f32 %v59_v13, %v59_v13  ;;  %v77_v26 = vand.u32 2147483647, %v74_v23  ;;  %v94_v30 = vmul.f32 1.442695, %v91_v27  ;;  %v98_v31 = vmul.f32 1.442695, %v93_v28 }
  0xa1   :  { %v86_v53 = vmul.f32 %v145_v45, %v74_v23  ;;  %v88_v54 = vadd.f32 %v85_v50, %v79_v44  ;;  %v90_v61 = vadd.f32 %v87_v47, %v81_v49 }
  0xa2   :  { %68 = vrot.lane.b32.xlu1 %v63_v12, %s241_s6  ;;  %66 = vrot.lane.b32.xlu0 %v62_v14, %s241_s6  ;;  %v92_v29 = vsub.f32 0.0, %v77_v26  ;;  %153 = vpow2.f32 %v94_v30  ;;  %v80_v51 = vmul.f32 0.5, %v77_v26 }
  0xa3   :  { %155 = vpow2.f32 %v98_v31 }
  0xa4   :  { %v96_v32 = vmul.f32 1.442695, %v92_v29  ;;  %v89_v60 = vadd.f32 %v86_v53, %v80_v51 }
  0xa6   :  { %157 = vpow2.f32 %v96_v32 }
  0xac   :  { %v154_v33 = vpop.eup %153 }
  0xad   :  { %v156_v34 = vpop.eup %155  ;;  %v100_v36 = vadd.f32 1.0, %v154_v33 }
  0xae   :  { %v102_v37 = vadd.f32 1.0, %v156_v34 }
  0xaf   :  { %159 = vlog2.f32 %v100_v36 }
  0xb0   :  { %v158_v35 = vpop.eup %157  ;;  %161 = vlog2.f32 %v102_v37 }
  0xb1   :  { %v101_v38 = vadd.f32 1.0, %v158_v35 }
  0xb3   :  { %163 = vlog2.f32 %v101_v38 }
  0xb9   :  { %v160_v42 = vpop.eup %159 }
  0xba   :  { %v162_v43 = vpop.eup %161  ;;  %v104_v52 = vmul.f32 0.6931472, %v160_v42 }
  0xbb   :  { %v108_v56 = vmul.f32 0.6931472, %v162_v43 }
  0xbc   :  { %v109_v59 = vadd.f32 %v104_v52, %v88_v54 }
  0xbd   :  { %v164_v46 = vpop.eup %163  ;;  %v111_v0 = vadd.f32 %v108_v56, %v90_v61 }
  0xbe   :  { %v106_v55 = vmul.f32 0.6931472, %v164_v46 }
  0xc0   :  { %v110_v63 = vadd.f32 %v106_v55, %v89_v60 }
 0x110   :  { %v65_v15 = vpop.permute.xlu1 %64 }
 0x111   :  { %v70_v16 = vadd.f32 %v65_v15, %v61_v10 }
 0x113   :  { %112 = vrot.lane.b32.xlu0 %v70_v16, %s241_s6 }
 0x114   :  { %v69_v17 = vpop.permute.xlu1 %68  ;;  %v67_v18 = vpop.permute.xlu0 %66 }
 0x115   :  { %v72_v19 = vadd.f32 %v69_v17, %v63_v12  ;;  %v71_v20 = vadd.f32 %v67_v18, %v62_v14 }
 0x117   :  { %116 = vrot.lane.b32.xlu0 %v72_v19, %s241_s6  ;;  %114 = vrot.lane.b32.xlu1 %v71_v20, %s241_s6 }
 0x185   :  { %v113_v58 = vpop.permute.xlu0 %112 }
 0x186   :  { %v118_v62 = vmul.f32 %v113_v58, %v109_v59 }
 0x188   :  { %v121_v5 = vsel %vm43_vm0, %v118_v62, 0.0 }
 0x189   :  { %v115_v1 = vpop.permute.xlu1 %114  ;;  %v117_v2 = vpop.permute.xlu0 %116 }
 0x18a   :  { %v119_v3 = vmul.f32 %v115_v1, %v110_v63  ;;  %v120_v4 = vmul.f32 %v117_v2, %v111_v0 }
 0x18c   :  { %v122_v6 = vsel %vm43_vm0, %v119_v3, 0.0  ;;  %v123_v8 = vsel %vm43_vm0, %v120_v4, 0.0 }
 0x18d   :  { %v124_v7 = vadd.f32 %v122_v6, %v121_v5 }
 0x18f   :  { %v125_v9 = vadd.f32 %v124_v7, %v123_v8 }
 0x191   :  { %127 = vst [vmem:[#allocation7] sm:$0xff] %v125_v9 }
 0x192   :  { %220 = shalt.err (!%p217_p6)
}
 0x193   :  { %s221_s11 = scalar_lea.hbm %s296_s2, 128 }
 0x194   :  { %p222_p7 = scmp.ne.s32.totalorder %s296_s2, %s221_s11  ;;  %p225_p8 = scmp.lt.u32.totalorder %s221_s11, %s296_s2 }
 0x196   :  { %p227_p9 = pnand %p225_p8, %p222_p7 }
 0x198   :  { %230 = shalt.err (!%p227_p9)
}
 0x199   :  { %137 = dma.vmem_to_hbm [thread:$0]  %s135_s7, 128, %s296_s2, [#allocation4]  }
 0x19a   :  { %235 = dma.done.wait [#allocation4], 128  }
 0x19b   :  { %236 = vsyncadd [#allocation4], 4294967168 }
 0x19c   :  { %141 = vsyncpa [#allocation3], 1 }
 0x19d   :  { %142 = vsyncpa [#allocation6], 1 }
 0x19e   :  { %143 = vsyncpa [#allocation4], 1 }

</bundles_post_ra>
